<compile_context>
chip_gen: v7x
topology: tpu7x:2x2x1
jax: 0.10.0
libtpu: 0.0.40
codegen_flags: <defaults>
</compile_context>

<pallas_src>
import jax
import jax.numpy as jnp
from jax.experimental import pallas as pl
from jax.experimental.pallas import tpu as pltpu


def _round_up(x: int, m: int) -> int:
    return ((x + m - 1) // m) * m


def ann_kernel(x_ref, w1_ref, b1_ref, w2_ref, b2_ref, o_ref):
    # First linear layer (MXU, f32 accumulate) + bias + ReLU in f32.
    h = jnp.dot(x_ref[...], w1_ref[...], preferred_element_type=jnp.float32)
    h = jnp.maximum(h + b1_ref[...], 0.0)          # (TB, 1024) + (1, 1024)
    # Second linear layer (MXU, f32 accumulate) + bias.
    out = jnp.dot(h.astype(w2_ref.dtype), w2_ref[...],
                  preferred_element_type=jnp.float32)
    o_ref[...] = (out + b2_ref[...]).astype(o_ref.dtype)


def ann_forward(x, w1, b1, w2, b2, *, block_batch=256,
                compute_dtype=jnp.bfloat16):
    """Runs the 2-layer MLP.  x: (B, 33); w1: (33, H); w2: (H, C)."""
    batch, in_features = x.shape
    hidden = w1.shape[1]
    num_classes = w2.shape[1]
    out_dtype = x.dtype

    # Lane-align the contraction dim (K) and the output dim (N) to 128.
    k_pad = _round_up(in_features, 128)
    n_pad = _round_up(num_classes, 128)

    # Batch tile: at most block_batch, at least a sublane-aligned full batch.
    tb = min(block_batch, _round_up(batch, 8))
    b_pad = _round_up(batch, tb)

    # Zero-padded, dtype-cast operands (weights padded once; zeros contribute 0).
    x_p = jnp.zeros((b_pad, k_pad), compute_dtype)
    x_p = x_p.at[:batch, :in_features].set(x.astype(compute_dtype))
    w1_p = jnp.zeros((k_pad, hidden), compute_dtype)
    w1_p = w1_p.at[:in_features, :].set(w1.astype(compute_dtype))
    b1_p = b1.reshape(1, hidden).astype(jnp.float32)
    w2_p = jnp.zeros((hidden, n_pad), compute_dtype)
    w2_p = w2_p.at[:, :num_classes].set(w2.astype(compute_dtype))
    b2_p = jnp.zeros((1, n_pad), jnp.float32)
    b2_p = b2_p.at[:, :num_classes].set(b2.reshape(1, -1).astype(jnp.float32))

    grid = (b_pad // tb,)

    bytes_accessed = (x_p.size * x_p.dtype.itemsize
                      + w1_p.size * w1_p.dtype.itemsize
                      + b1_p.size * b1_p.dtype.itemsize
                      + w2_p.size * w2_p.dtype.itemsize
                      + b2_p.size * b2_p.dtype.itemsize
                      + b_pad * n_pad * jnp.dtype(out_dtype).itemsize)
    cost = pl.CostEstimate(
        flops=2 * b_pad * (k_pad * hidden + hidden * n_pad),
        transcendentals=0,
        bytes_accessed=bytes_accessed,
    )

    out_padded = pl.pallas_call(
        ann_kernel,
        out_shape=jax.ShapeDtypeStruct((b_pad, n_pad), out_dtype),
        grid=grid,
        in_specs=[
            pl.BlockSpec((tb, k_pad), lambda i: (i, 0)),      # x tile streams
            pl.BlockSpec((k_pad, hidden), lambda i: (0, 0)),  # weights resident
            pl.BlockSpec((1, hidden), lambda i: (0, 0)),
            pl.BlockSpec((hidden, n_pad), lambda i: (0, 0)),
            pl.BlockSpec((1, n_pad), lambda i: (0, 0)),
        ],
        out_specs=pl.BlockSpec((tb, n_pad), lambda i: (i, 0)),
        compiler_params=pltpu.CompilerParams(
            dimension_semantics=("parallel",),
            vmem_limit_bytes=32 << 20,
        ),
        cost_estimate=cost,
    )(x_p, w1_p, b1_p, w2_p, b2_p)

    return out_padded[:batch, :num_classes]


def init_params(key, in_features=33, hidden=1024, num_classes=10,
                dtype=jnp.float32):
    """Deterministic init mimicking PyTorch nn.Linear (uniform ±1/sqrt(fan_in))."""
    k1, k2, k3, k4 = jax.random.split(key, 4)
    bound1 = 1.0 / jnp.sqrt(in_features)
    bound2 = 1.0 / jnp.sqrt(hidden)
    w1 = jax.random.uniform(k1, (in_features, hidden), dtype, -bound1, bound1)
    b1 = jax.random.uniform(k2, (1, hidden), dtype, -bound1, bound1)
    w2 = jax.random.uniform(k3, (hidden, num_classes), dtype, -bound2, bound2)
    b2 = jax.random.uniform(k4, (1, num_classes), dtype, -bound2, bound2)
    return w1, b1, w2, b2


if __name__ == "__main__":
    key = jax.random.PRNGKey(0)
    kx, kp = jax.random.split(key)

    batch, in_features, num_classes = 8, 33, 10
    x = jax.random.normal(kx, (batch, in_features), jnp.float32)
    w1, b1, w2, b2 = init_params(kp, in_features=in_features,
                                 hidden=1024, num_classes=num_classes)

    out = ann_forward(x, w1, b1, w2, b2)
    out = jax.block_until_ready(out)

    # Cross-check against plain JAX f32 reference (bf16 compute -> loose tol).
    ref = jnp.maximum(x @ w1 + b1, 0.0) @ w2 + b2
    assert out.shape == (batch, num_classes)
    assert jnp.all(jnp.isfinite(out))
    assert jnp.allclose(out, ref, atol=5e-2, rtol=5e-2)

    print("KERNEL_OK")
</pallas_src>

<mosaic_0001>
module attributes {stable_mosaic.version = 11 : i64} {
  func.func @ann_kernel(%arg0: i32, %arg1: memref<8x128xbf16, #tpu.memory_space<vmem>>, %arg2: memref<128x1024xbf16, #tpu.memory_space<vmem>>, %arg3: memref<1x1024xf32, #tpu.memory_space<vmem>>, %arg4: memref<1024x128xbf16, #tpu.memory_space<vmem>>, %arg5: memref<1x128xf32, #tpu.memory_space<vmem>>, %arg6: memref<8x128xf32, #tpu.memory_space<vmem>>) attributes {dimension_semantics = [#tpu.dimension_semantics<parallel>], iteration_bounds = array<i64: 1>, scalar_prefetch = 0 : i64, scratch_operands = 0 : i64, tpu.core_type = #tpu.core_type<tc>, window_params = [{transform_indices = @transform_0, window_bounds = array<i64: 8, 128>}, {pipeline_mode = #tpu.pipeline_mode<synchronous>, transform_indices = @transform_1, window_bounds = array<i64: 128, 1024>}, {pipeline_mode = #tpu.pipeline_mode<synchronous>, transform_indices = @transform_2, window_bounds = array<i64: 1, 1024>}, {pipeline_mode = #tpu.pipeline_mode<synchronous>, transform_indices = @transform_3, window_bounds = array<i64: 1024, 128>}, {pipeline_mode = #tpu.pipeline_mode<synchronous>, transform_indices = @transform_4, window_bounds = array<i64: 1, 128>}, {transform_indices = @transform_5, window_bounds = array<i64: 8, 128>}]} {
    %c0 = arith.constant 0 : index
    %c0_0 = arith.constant 0 : index
    %0 = vector.load %arg1[%c0, %c0_0] : memref<8x128xbf16, #tpu.memory_space<vmem>>, vector<8x128xbf16>
    %c0_1 = arith.constant 0 : index
    %c0_2 = arith.constant 0 : index
    %1 = vector.load %arg2[%c0_1, %c0_2] : memref<128x1024xbf16, #tpu.memory_space<vmem>>, vector<128x1024xbf16>
    %cst = arith.constant dense<0.000000e+00> : vector<8x1024xf32>
    %2 = tpu.matmul %0, %1, %cst {dimension_numbers = #tpu.dot_dimension_numbers<[1], [0], [0], [1], [0, 0, 1, 1], [], []>} : vector<8x128xbf16>, vector<128x1024xbf16>, vector<8x1024xf32> -> vector<8x1024xf32>
    %c0_3 = arith.constant 0 : index
    %c0_4 = arith.constant 0 : index
    %3 = vector.load %arg3[%c0_3, %c0_4] : memref<1x1024xf32, #tpu.memory_space<vmem>>, vector<1x1024xf32>
    %4 = vector.broadcast %3 : vector<1x1024xf32> to vector<8x1024xf32>
    %5 = arith.addf %2, %4 : vector<8x1024xf32>
    %cst_5 = arith.constant 0.000000e+00 : f32
    %6 = vector.broadcast %cst_5 : f32 to vector<8x1024xf32>
    %7 = arith.maximumf %5, %6 : vector<8x1024xf32>
    %8 = arith.truncf %7 : vector<8x1024xf32> to vector<8x1024xbf16>
    %c0_6 = arith.constant 0 : index
    %c0_7 = arith.constant 0 : index
    %9 = vector.load %arg4[%c0_6, %c0_7] : memref<1024x128xbf16, #tpu.memory_space<vmem>>, vector<1024x128xbf16>
    %cst_8 = arith.constant dense<0.000000e+00> : vector<8x128xf32>
    %10 = tpu.matmul %8, %9, %cst_8 {dimension_numbers = #tpu.dot_dimension_numbers<[1], [0], [0], [1], [0, 0, 1, 1], [], []>} : vector<8x1024xbf16>, vector<1024x128xbf16>, vector<8x128xf32> -> vector<8x128xf32>
    %c0_9 = arith.constant 0 : index
    %c0_10 = arith.constant 0 : index
    %11 = vector.load %arg5[%c0_9, %c0_10] : memref<1x128xf32, #tpu.memory_space<vmem>>, vector<1x128xf32>
    %12 = vector.broadcast %11 : vector<1x128xf32> to vector<8x128xf32>
    %13 = arith.addf %10, %12 : vector<8x128xf32>
    %c0_11 = arith.constant 0 : index
    %c0_12 = arith.constant 0 : index
    %14 = vector.load %arg6[%c0_11, %c0_12] : memref<8x128xf32, #tpu.memory_space<vmem>>, vector<8x128xf32>
    tpu.vector_store %arg6[%c0_11, %c0_12], %13 {strides = array<i32>} : memref<8x128xf32, #tpu.memory_space<vmem>>, vector<8x128xf32>,
    return
  }
  func.func @transform_0(%arg0: i32) -> (i32, i32) {
    %c0_i32 = arith.constant 0 : i32
    %c0_i32_0 = arith.constant 0 : i32
    return %arg0, %c0_i32 : i32, i32
  }
  func.func @transform_1(%arg0: i32) -> (i32, i32) {
    %c0_i32 = arith.constant 0 : i32
    %c0_i32_0 = arith.constant 0 : i32
    %c0_i32_1 = arith.constant 0 : i32
    return %c0_i32, %c0_i32_0 : i32, i32
  }
  func.func @transform_2(%arg0: i32) -> (i32, i32) {
    %c0_i32 = arith.constant 0 : i32
    %c0_i32_0 = arith.constant 0 : i32
    %c0_i32_1 = arith.constant 0 : i32
    return %c0_i32, %c0_i32_0 : i32, i32
  }
  func.func @transform_3(%arg0: i32) -> (i32, i32) {
    %c0_i32 = arith.constant 0 : i32
    %c0_i32_0 = arith.constant 0 : i32
    %c0_i32_1 = arith.constant 0 : i32
    return %c0_i32, %c0_i32_0 : i32, i32
  }
  func.func @transform_4(%arg0: i32) -> (i32, i32) {
    %c0_i32 = arith.constant 0 : i32
    %c0_i32_0 = arith.constant 0 : i32
    %c0_i32_1 = arith.constant 0 : i32
    return %c0_i32, %c0_i32_0 : i32, i32
  }
  func.func @transform_5(%arg0: i32) -> (i32, i32) {
    %c0_i32 = arith.constant 0 : i32
    %c0_i32_0 = arith.constant 0 : i32
    return %arg0, %c0_i32 : i32, i32
  }
}

</mosaic_0001>

<bundles_post_ra>
// kernel: tpu_custom_call.1
= control target key start
LH: loop header
LB: loop body
LE: loop exit
PB: predicated region body
PF: predicated region fallthrough
CT: control target
= control target key end

     0   :  { %10 = vsyncpa [#allocation3], 0  ;;  %s1919_s0 = inlined_call_operand.hbm [shape: bf16[8,128], index: 0, kind: input, shape index: {}]   ;;  %s1920_s1 = inlined_call_operand.hbm [shape: bf16[128,1024], index: 1, kind: input, shape index: {}]   ;;  %s1921_s2 = inlined_call_operand.hbm [shape: f32[1,1024], index: 2, kind: input, shape index: {}]   ;;  %s1922_s3 = inlined_call_operand.hbm [shape: bf16[1024,128], index: 3, kind: input, shape index: {}]   ;;  %s1923_s4 = inlined_call_operand.vmem [shape: f32[1,128], index: 4, kind: input, shape index: {}]   ;;  %s1924_s5 = inlined_call_operand.hbm [shape: f32[8,128], index: 5, kind: output, shape index: {}]  }
   0x1   :  { %11 = vsyncpa [#allocation6], 0 }
   0x2   :  { %12 = vsyncpa [#allocation9], 0 }
   0x3   :  { %13 = vsyncpa [#allocation4], 0  ;;  %s1786_s18 = smov [#allocation5]   ;;  %s1668_s22 = scalar_lea.hbm %s1920_s1, 8192 }
   0x4   :  { %s29_s19 = sshll.u32 %s1786_s18, 4  ;;  %p1669_p0 = scmp.ne.s32.totalorder %s1920_s1, %s1668_s22  ;;  %s30_s19 = int_to_ptr.vmem [resolvable:$true] %s29_s19 }
   0x5   :  { %p1672_p1 = scmp.lt.u32.totalorder %s1668_s22, %s1920_s1 }
   0x7   :  { %p1674_p2 = pnand %p1672_p1, %p1669_p0 }
   0x9   :  { %1677 = shalt.err (!%p1674_p2)
}
   0xa   :  { %s1678_s27 = scalar_lea.vmem %s30_s19, 8192  ;;  %p1683_p4 = scmp.lt.s32.totalorder %s30_s19, %s30_s19 }
   0xb   :  { %p1679_p3 = scmp.ne.s32.totalorder %s30_s19, %s1678_s27  ;;  %p1684_p5 = scmp.lt.s32.totalorder %s1678_s27, %s1678_s27 }
   0xd   :  { %p1685_p6 = por %p1684_p5, %p1683_p4 }
   0xf   :  { %p1686_p7 = pnand %p1685_p6, %p1679_p3 }
  0x11   :  { %1689 = shalt.err (!%p1686_p7)
}
  0x12   :  { %s1787_s28 = smov 512   ;;  %s1788_s29 = smov 32  }
  0x13   :  { %35 = dma.hbm_to_vmem [thread:$0]  %s1920_s1, 8192, %s30_s19, [#allocation6], %s1787_s28, %s1787_s28, %s1788_s29  }
  0x14   :  { %s1789_s7 = smov [#allocation2]   ;;  %s1790_s9 = smov [#allocation7]  }
  0x15   :  { %s20_s8 = sshll.u32 %s1789_s7, 4  ;;  %s42_s10 = sshll.u32 %s1790_s9, 4  ;;  %s21_s8 = int_to_ptr.vmem [resolvable:$true] %s20_s8  ;;  %s43_s10 = int_to_ptr.vmem [resolvable:$true] %s42_s10 }
  0x16   :  { %s1690_s13 = scalar_lea.hbm %s1919_s0, 64 }
  0x17   :  { %p1691_p8 = scmp.ne.s32.totalorder %s1919_s0, %s1690_s13  ;;  %p1694_p9 = scmp.lt.u32.totalorder %s1690_s13, %s1919_s0 }
  0x19   :  { %p1696_p10 = pnand %p1694_p9, %p1691_p8 }
  0x1b   :  { %1699 = shalt.err (!%p1696_p10)
}
  0x1c   :  { %s1700_s1 = scalar_lea.vmem %s21_s8, 64  ;;  %p1705_p12 = scmp.lt.s32.totalorder %s21_s8, %s21_s8 }
  0x1d   :  { %p1701_p11 = scmp.ne.s32.totalorder %s21_s8, %s1700_s1  ;;  %p1706_p13 = scmp.lt.s32.totalorder %s1700_s1, %s1700_s1 }
  0x1f   :  { %p1707_p0 = por %p1706_p13, %p1705_p12 }
  0x21   :  { %p1708_p1 = pnand %p1707_p0, %p1701_p11 }
  0x23   :  { %1711 = shalt.err (!%p1708_p1)
}
  0x24   :  { %23 = dma.hbm_to_vmem [thread:$0]  %s1919_s0, 64, %s21_s8, [#allocation3]  }
  0x25   :  { %s1712_s22 = scalar_lea.hbm %s1921_s2, 128 }
  0x26   :  { %p1713_p2 = scmp.ne.s32.totalorder %s1921_s2, %s1712_s22  ;;  %p1716_p3 = scmp.lt.u32.totalorder %s1712_s22, %s1921_s2 }
  0x28   :  { %p1718_p4 = pnand %p1716_p3, %p1713_p2 }
  0x2a   :  { %1721 = shalt.err (!%p1718_p4)
}
  0x2b   :  { %s1722_s27 = scalar_lea.vmem %s43_s10, 128  ;;  %p1727_p6 = scmp.lt.s32.totalorder %s43_s10, %s43_s10 }
  0x2c   :  { %p1723_p5 = scmp.ne.s32.totalorder %s43_s10, %s1722_s27  ;;  %p1728_p7 = scmp.lt.s32.totalorder %s1722_s27, %s1722_s27 }
  0x2e   :  { %p1729_p8 = por %p1728_p7, %p1727_p6 }
  0x30   :  { %p1730_p9 = pnand %p1729_p8, %p1723_p5 }
  0x32   :  { %1733 = shalt.err (!%p1730_p9)
}
  0x33   :  { %45 = dma.hbm_to_vmem [thread:$0]  %s1921_s2, 128, %s43_s10, [#allocation6]  }
  0x34   :  { %s1791_s29 = smov [#allocation8]   ;;  %s1734_s8 = scalar_lea.hbm %s1922_s3, 8192 }
  0x35   :  { %s51_s30 = sshll.u32 %s1791_s29, 4  ;;  %p1735_p10 = scmp.ne.s32.totalorder %s1922_s3, %s1734_s8  ;;  %s52_s30 = int_to_ptr.vmem [resolvable:$true] %s51_s30 }
  0x36   :  { %p1738_p11 = scmp.lt.u32.totalorder %s1734_s8, %s1922_s3 }
  0x38   :  { %p1740_p12 = pnand %p1738_p11, %p1735_p10 }
  0x3a   :  { %1743 = shalt.err (!%p1740_p12)
}
  0x3b   :  { %s1744_s14 = scalar_lea.vmem %s52_s30, 8192  ;;  %p1749_p0 = scmp.lt.s32.totalorder %s52_s30, %s52_s30 }
  0x3c   :  { %p1745_p13 = scmp.ne.s32.totalorder %s52_s30, %s1744_s14  ;;  %p1750_p1 = scmp.lt.s32.totalorder %s1744_s14, %s1744_s14 }
  0x3e   :  { %p1751_p2 = por %p1750_p1, %p1749_p0 }
  0x40   :  { %p1752_p3 = pnand %p1751_p2, %p1745_p13 }
  0x42   :  { %1755 = shalt.err (!%p1752_p3)
}
  0x43   :  { %s1792_s2 = smov 64   ;;  %s1793_s10 = smov 4  }
  0x44   :  { %57 = dma.hbm_to_vmem [thread:$0]  %s1922_s3, 8192, %s52_s30, [#allocation9], %s1792_s2, %s1792_s2, %s1793_s10  }
  0x45   :  { %1778 = dma.done.wait [#allocation3], 64  }
  0x46   :  { %1779 = vsyncadd [#allocation3], 4294967232 }
  0x47   :  { %1780 = dma.done.wait [#allocation6], 8320  }
  0x48   :  { %1781 = vsyncadd [#allocation6], 4294958976 }
  0x49   :  { %1782 = dma.done.wait [#allocation9], 8192  }
  0x4a   :  { %1783 = vsyncadd [#allocation9], 4294959104  ;;  %v1794_v0 = vmov 0   ;;  %v74_v1 = vld [vmem:[#allocation5] sm:$0xff]  ;;  %v75_v3 = vld [vmem:[#allocation5 + $0x8] sm:$0xff] }
  0x4b   :  { %532 = vmatprep.mubr.bf16.mxu0 %v1794_v0  ;;  %573 = vmatprep.mubr.bf16.mxu1 %v1794_v0  ;;  %v78_v2 = vld [vmem:[#allocation5 + $0x20] sm:$0xff]  ;;  %v79_v5 = vld [vmem:[#allocation5 + $0x28] sm:$0xff]  ;;  %v76_v60 = vld [vmem:[#allocation5 + $0x10] sm:$0xff] }
  0x4c   :  { %v1378_v4 = vcombine.high %v74_v1, %v78_v2  ;;  %v1377_v6 = vcombine.low %v74_v1, %v78_v2  ;;  %v82_v7 = vld [vmem:[#allocation5 + $0x40] sm:$0xff]  ;;  %v1380_v9 = vcombine.high %v75_v3, %v79_v5  ;;  %v1379_v10 = vcombine.low %v75_v3, %v79_v5  ;;  %v83_v12 = vld [vmem:[#allocation5 + $0x48] sm:$0xff]  ;;  %v80_v63 = vld [vmem:[#allocation5 + $0x30] sm:$0xff] }
  0x4d   :  { %v86_v8 = vld [vmem:[#allocation5 + $0x60] sm:$0xff]  ;;  %v87_v13 = vld [vmem:[#allocation5 + $0x68] sm:$0xff]  ;;  %v77_v2 = vld [vmem:[#allocation5 + $0x18] sm:$0xff] }
  0x4e   :  { %v1386_v11 = vcombine.high %v82_v7, %v86_v8  ;;  %v90_v14 = vld [vmem:[#allocation5 + $0x80] sm:$0xff]  ;;  %500 = vmatprep.subr.bf16.mxu0 %v1378_v4  ;;  %v1388_v15 = vcombine.high %v83_v12, %v87_v13  ;;  %v91_v17 = vld [vmem:[#allocation5 + $0x88] sm:$0xff]  ;;  %541 = vmatprep.subr.bf16.mxu1 %v1380_v9  ;;  %v1385_v19 = vcombine.low %v82_v7, %v86_v8  ;;  %v81_v3 = vld [vmem:[#allocation5 + $0x38] sm:$0xff] }
  0x4f   :  { %v94_v16 = vld [vmem:[#allocation5 + $0xa0] sm:$0xff]  ;;  %v95_v18 = vld [vmem:[#allocation5 + $0xa8] sm:$0xff]  ;;  %501 = vmatpush1.bf16.msra.mxu0 %v1377_v6  ;;  %542 = vmatpush1.bf16.msra.mxu1 %v1379_v10  ;;  %v1387_v20 = vcombine.low %v83_v12, %v87_v13  ;;  %v84_v5 = vld [vmem:[#allocation5 + $0x50] sm:$0xff]  ;;  %v1382_v7 = vcombine.high %v76_v60, %v80_v63  ;;  %v1384_v10 = vcombine.high %v77_v2, %v81_v3 }
  0x50   :  { %502 = vmatprep.subr.bf16.mxu0 %v1386_v11  ;;  %v1394_v21 = vcombine.high %v90_v14, %v94_v16  ;;  %543 = vmatprep.subr.bf16.mxu1 %v1388_v15  ;;  %v1396_v22 = vcombine.high %v91_v17, %v95_v18  ;;  %v98_v23 = vld [vmem:[#allocation5 + $0xc0] sm:$0xff]  ;;  %v99_v25 = vld [vmem:[#allocation5 + $0xc8] sm:$0xff]  ;;  %v1393_v27 = vcombine.low %v90_v14, %v94_v16  ;;  %v88_v8 = vld [vmem:[#allocation5 + $0x70] sm:$0xff] }
  0x51   :  { %v102_v24 = vld [vmem:[#allocation5 + $0xe0] sm:$0xff]  ;;  %v103_v26 = vld [vmem:[#allocation5 + $0xe8] sm:$0xff]  ;;  %v1395_v28 = vcombine.low %v91_v17, %v95_v18  ;;  %v1876_v9 = vld [vmem:[#allocation2] sm:$0xf]  ;;  %v1381_v13 = vcombine.low %v76_v60, %v80_v63  ;;  %v1383_v15 = vcombine.low %v77_v2, %v81_v3  ;;  %v1390_v16 = vcombine.high %v84_v5, %v88_v8 }
  0x52   :  { %v1402_v29 = vcombine.high %v98_v23, %v102_v24  ;;  %v1404_v30 = vcombine.high %v99_v25, %v103_v26  ;;  %v106_v31 = vld [vmem:[#allocation5 + $0x100] sm:$0xff]  ;;  %v107_v33 = vld [vmem:[#allocation5 + $0x108] sm:$0xff]  ;;  %v1401_v35 = vcombine.low %v98_v23, %v102_v24  ;;  %v1403_v36 = vcombine.low %v99_v25, %v103_v26  ;;  %v85_v11 = vld [vmem:[#allocation5 + $0x58] sm:$0xff] }
  0x53   :  { %503 = vmatpush1.bf16.msra.mxu0 %v1385_v19  ;;  %544 = vmatpush1.bf16.msra.mxu1 %v1387_v20  ;;  %v110_v32 = vld [vmem:[#allocation5 + $0x120] sm:$0xff]  ;;  %v111_v34 = vld [vmem:[#allocation5 + $0x128] sm:$0xff]  ;;  %v89_v12 = vld [vmem:[#allocation5 + $0x78] sm:$0xff] }
  0x54   :  { %504 = vmatprep.subr.bf16.mxu0 %v1394_v21  ;;  %545 = vmatprep.subr.bf16.mxu1 %v1396_v22  ;;  %v1410_v37 = vcombine.high %v106_v31, %v110_v32  ;;  %v1412_v38 = vcombine.high %v107_v33, %v111_v34  ;;  %v114_v39 = vld [vmem:[#allocation5 + $0x140] sm:$0xff]  ;;  %v115_v41 = vld [vmem:[#allocation5 + $0x148] sm:$0xff]  ;;  %v1409_v43 = vcombine.low %v106_v31, %v110_v32  ;;  %v92_v14 = vld [vmem:[#allocation5 + $0x90] sm:$0xff] }
  0x55   :  { %v118_v40 = vld [vmem:[#allocation5 + $0x160] sm:$0xff]  ;;  %v119_v42 = vld [vmem:[#allocation5 + $0x168] sm:$0xff]  ;;  %v1411_v44 = vcombine.low %v107_v33, %v111_v34  ;;  %v96_v17 = vld [vmem:[#allocation5 + $0xb0] sm:$0xff]  ;;  %v1392_v18 = vcombine.high %v85_v11, %v89_v12  ;;  %v1389_v21 = vcombine.low %v84_v5, %v88_v8  ;;  %v1391_v23 = vcombine.low %v85_v11, %v89_v12 }
  0x56   :  { %v1418_v45 = vcombine.high %v114_v39, %v118_v40  ;;  %v1420_v46 = vcombine.high %v115_v41, %v119_v42  ;;  %v122_v47 = vld [vmem:[#allocation5 + $0x180] sm:$0xff]  ;;  %v123_v49 = vld [vmem:[#allocation5 + $0x188] sm:$0xff]  ;;  %v1417_v51 = vcombine.low %v114_v39, %v118_v40  ;;  %v1419_v52 = vcombine.low %v115_v41, %v119_v42  ;;  %v93_v19 = vld [vmem:[#allocation5 + $0x98] sm:$0xff] }
  0x57   :  { %505 = vmatpush1.bf16.msra.mxu0 %v1393_v27  ;;  %546 = vmatpush1.bf16.msra.mxu1 %v1395_v28  ;;  %v126_v48 = vld [vmem:[#allocation5 + $0x1a0] sm:$0xff]  ;;  %v127_v50 = vld [vmem:[#allocation5 + $0x1a8] sm:$0xff]  ;;  %v97_v20 = vld [vmem:[#allocation5 + $0xb8] sm:$0xff]  ;;  %v1398_v24 = vcombine.high %v92_v14, %v96_v17 }
  0x58   :  { %506 = vmatprep.subr.bf16.mxu0 %v1402_v29  ;;  %547 = vmatprep.subr.bf16.mxu1 %v1404_v30  ;;  %v1426_v53 = vcombine.high %v122_v47, %v126_v48  ;;  %v130_v54 = vld [vmem:[#allocation5 + $0x1c0] sm:$0xff]  ;;  %v1428_v56 = vcombine.high %v123_v49, %v127_v50  ;;  %v131_v57 = vld [vmem:[#allocation5 + $0x1c8] sm:$0xff]  ;;  %v1425_v59 = vcombine.low %v122_v47, %v126_v48  ;;  %v100_v22 = vld [vmem:[#allocation5 + $0xd0] sm:$0xff] }
  0x59   :  { %v134_v55 = vld [vmem:[#allocation5 + $0x1e0] sm:$0xff]  ;;  %v135_v58 = vld [vmem:[#allocation5 + $0x1e8] sm:$0xff]  ;;  %v1427_v61 = vcombine.low %v123_v49, %v127_v50  ;;  %v104_v25 = vld [vmem:[#allocation5 + $0xf0] sm:$0xff]  ;;  %v1400_v26 = vcombine.high %v93_v19, %v97_v20  ;;  %v1397_v29 = vcombine.low %v92_v14, %v96_v17  ;;  %v1399_v31 = vcombine.low %v93_v19, %v97_v20 }
  0x5a   :  { %v1434_v62 = vcombine.high %v130_v54, %v134_v55  ;;  %v1436_v1 = vcombine.high %v131_v57, %v135_v58  ;;  %v1433_v4 = vcombine.low %v130_v54, %v134_v55  ;;  %v1435_v6 = vcombine.low %v131_v57, %v135_v58  ;;  %v101_v27 = vld [vmem:[#allocation5 + $0xd8] sm:$0xff]  ;;  %v108_v30 = vld [vmem:[#allocation5 + $0x110] sm:$0xff]  ;;  %v1605_v3 = vld [vmem:[#allocation8 + $0xc0] sm:$0xff]  }
  0x5b   :  { %507 = vmatpush1.bf16.msra.mxu0 %v1401_v35  ;;  %548 = vmatpush1.bf16.msra.mxu1 %v1403_v36  ;;  %v105_v28 = vld [vmem:[#allocation5 + $0xf8] sm:$0xff]  ;;  %v1406_v32 = vcombine.high %v100_v22, %v104_v25  ;;  %v112_v33 = vld [vmem:[#allocation5 + $0x130] sm:$0xff]  ;;  %v1606_v5 = vld [vmem:[#allocation8] sm:$0xff]  }
  0x5c   :  { %508 = vmatprep.subr.bf16.mxu0 %v1410_v37  ;;  %549 = vmatprep.subr.bf16.mxu1 %v1412_v38  ;;  %v1408_v34 = vcombine.high %v101_v27, %v105_v28  ;;  %v109_v35 = vld [vmem:[#allocation5 + $0x118] sm:$0xff]  ;;  %v1405_v37 = vcombine.low %v100_v22, %v104_v25  ;;  %v116_v38 = vld [vmem:[#allocation5 + $0x150] sm:$0xff]  ;;  %v1407_v40 = vcombine.low %v101_v27, %v105_v28  ;;  %v1617_v17 = vld [vmem:[#allocation8 + $0xd8] sm:$0xff]  }
  0x5d   :  { %v113_v36 = vld [vmem:[#allocation5 + $0x138] sm:$0xff]  ;;  %v120_v39 = vld [vmem:[#allocation5 + $0x170] sm:$0xff]  ;;  %v1619_v19 = vld [vmem:[#allocation8 + $0x98] sm:$0xff]  }
  0x5e   :  { %v117_v41 = vld [vmem:[#allocation5 + $0x158] sm:$0xff]  ;;  %v1415_v47 = vcombine.low %v109_v35, %v113_v36  ;;  %v1422_v48 = vcombine.high %v116_v38, %v120_v39  ;;  %v136_v54 = vld [vmem:[#allocation5 + $0x1f0] sm:$0xff]  ;;  %v1620_v20 = vld [vmem:[#allocation8 + $0x60] sm:$0xff]  }
  0x5f   :  { %509 = vmatpush1.bf16.msra.mxu0 %v1409_v43  ;;  %550 = vmatpush1.bf16.msra.mxu1 %v1411_v44  ;;  %v121_v42 = vld [vmem:[#allocation5 + $0x178] sm:$0xff]  ;;  %v1416_v43 = vcombine.high %v109_v35, %v113_v36  ;;  %v1413_v44 = vcombine.low %v108_v30, %v112_v33  ;;  %v1609_v8 = vld [vmem:[#allocation8 + $0xc8] sm:$0xff]   ;;  %v1623_v22 = vld [vmem:[#allocation8 + $0xa0] sm:$0xff]  }
  0x60   :  { %510 = vmatprep.subr.bf16.mxu0 %v1418_v45  ;;  %551 = vmatprep.subr.bf16.mxu1 %v1420_v46  ;;  %v124_v45 = vld [vmem:[#allocation5 + $0x190] sm:$0xff]  ;;  %v125_v49 = vld [vmem:[#allocation5 + $0x198] sm:$0xff]  ;;  %v1423_v55 = vcombine.low %v117_v41, %v121_v42  ;;  %v1636_v35 = vld [vmem:[#allocation8 + $0x140] sm:$0xff]  }
  0x61   :  { %v128_v46 = vld [vmem:[#allocation5 + $0x1b0] sm:$0xff]  ;;  %v129_v50 = vld [vmem:[#allocation5 + $0x1b8] sm:$0xff]  ;;  %v1637_v36 = vld [vmem:[#allocation8 + $0x1c0] sm:$0xff]  }
  0x62   :  { %v133_v57 = vld [vmem:[#allocation5 + $0x1d8] sm:$0xff]  ;;  %v1429_v60 = vcombine.low %v124_v45, %v128_v46  ;;  %v1611_v11 = vld [vmem:[#allocation8 + $0x88] sm:$0xff]  }
  0x63   :  { %511 = vmatpush1.bf16.msra.mxu0 %v1417_v51  ;;  %552 = vmatpush1.bf16.msra.mxu1 %v1419_v52  ;;  %v1424_v51 = vcombine.high %v117_v41, %v121_v42  ;;  %v1421_v52 = vcombine.low %v116_v38, %v120_v39  ;;  %v137_v58 = vld [vmem:[#allocation5 + $0x1f8] sm:$0xff]  ;;  %v1626_v25 = vld [vmem:[#allocation8 + $0x28] sm:$0xff]  }
  0x64   :  { %512 = vmatprep.subr.bf16.mxu0 %v1426_v53  ;;  %553 = vmatprep.subr.bf16.mxu1 %v1428_v56  ;;  %v132_v53 = vld [vmem:[#allocation5 + $0x1d0] sm:$0xff]  ;;  %v1430_v56 = vcombine.high %v124_v45, %v128_v46  ;;  %v1440_v63 = vcombine.high %v133_v57, %v137_v58  ;;  %v1612_v12 = vld [vmem:[#allocation8 + $0x50] sm:$0xff]  }
  0x65   :  { %v1437_v2 = vcombine.low %v132_v53, %v136_v54  ;;  %v1614_v14 = vld [vmem:[#allocation8 + $0x10] sm:$0xff]  }
  0x66   :  { %v1628_v27 = vld [vmem:[#allocation8 + $0x70] sm:$0xff]  }
  0x67   :  { %513 = vmatpush1.bf16.msra.mxu0 %v1425_v59  ;;  %554 = vmatpush1.bf16.msra.mxu1 %v1427_v61  ;;  %v1432_v59 = vcombine.high %v125_v49, %v129_v50  ;;  %v1431_v61 = vcombine.low %v125_v49, %v129_v50  ;;  %v1629_v28 = vld [vmem:[#allocation8 + $0xf0] sm:$0xff]  }
  0x68   :  { %514 = vmatprep.subr.bf16.mxu0 %v1434_v62  ;;  %555 = vmatprep.subr.bf16.mxu1 %v1436_v1  ;;  %v1438_v62 = vcombine.high %v132_v53, %v136_v54  ;;  %v1604_v1 = vld [vmem:[#allocation8 + $0x40] sm:$0xff]  }
  0x6b   :  { %515 = vmatpush1.bf16.msra.mxu0 %v1433_v4  ;;  %556 = vmatpush1.bf16.msra.mxu1 %v1435_v6  ;;  %v1439_v4 = vcombine.low %v133_v57, %v137_v58  ;;  %v1607_v6 = vld [vmem:[#allocation8 + $0x80] sm:$0xff]  }
  0x6c   :  { %582 = vmatprep.subr.bf16.mxu0 %v1382_v7  ;;  %623 = vmatprep.subr.bf16.mxu1 %v1384_v10  ;;  %v1608_v7 = vld [vmem:[#allocation8 + $0x48] sm:$0xff]  }
  0x6d   :  { %v1610_v10 = vld [vmem:[#allocation8 + $0x8] sm:$0xff]  }
  0x6e   :  { %533 = vmatmul.mubr.bf16.vlgmr.msra.gmra.mrb[0].mxu0 %v1876_v9  ;;  %574 = vmatmul.mubr.bf16.vlgmr.msra.gmra.mrb[0].mxu1 %v1876_v9 }
  0x6f   :  { %583 = vmatpush1.bf16.msra.mxu0 %v1381_v13  ;;  %624 = vmatpush1.bf16.msra.mxu1 %v1383_v15  ;;  %v1613_v13 = vld [vmem:[#allocation8 + $0xd0] sm:$0xff]  }
  0x70   :  { %584 = vmatprep.subr.bf16.mxu0 %v1390_v16  ;;  %625 = vmatprep.subr.bf16.mxu1 %v1392_v18  ;;  %v1615_v15 = vld [vmem:[#allocation8 + $0x90] sm:$0xff]   ;;  %v1616_v16 = vld [vmem:[#allocation8 + $0x58] sm:$0xff]  }
  0x71   :  { %614 = vmatprep.mubr.bf16.mxu0 %v1794_v0  ;;  %655 = vmatprep.mubr.bf16.mxu1 %v1794_v0  ;;  %v1414_v0 = vcombine.high %v108_v30, %v112_v33  ;;  %v1618_v18 = vld [vmem:[#allocation8 + $0x18] sm:$0xff]   ;;  %v1631_v30 = vld [vmem:[#allocation8 + $0xb0] sm:$0xff]  }
  0x72   :  { %v1634_v33 = vld [vmem:[#allocation8 + $0x38] sm:$0xff]  }
  0x73   :  { %585 = vmatpush1.bf16.msra.mxu0 %v1389_v21  ;;  %626 = vmatpush1.bf16.msra.mxu1 %v1391_v23  ;;  %v1622_v21 = vld [vmem:[#allocation8 + $0x20] sm:$0xff]   ;;  %v1624_v23 = vld [vmem:[#allocation8 + $0x68] sm:$0xff]  }
  0x74   :  { %586 = vmatprep.subr.bf16.mxu0 %v1398_v24  ;;  %627 = vmatprep.subr.bf16.mxu1 %v1400_v26  ;;  %v1625_v24 = vld [vmem:[#allocation8 + $0xe8] sm:$0xff]  }
  0x75   :  { %v1627_v26 = vld [vmem:[#allocation8 + $0xa8] sm:$0xff]  }
  0x77   :  { %587 = vmatpush1.bf16.msra.mxu0 %v1397_v29  ;;  %628 = vmatpush1.bf16.msra.mxu1 %v1399_v31  ;;  %v1630_v29 = vld [vmem:[#allocation8 + $0x30] sm:$0xff]   ;;  %v1632_v31 = vld [vmem:[#allocation8 + $0x78] sm:$0xff]  }
  0x78   :  { %588 = vmatprep.subr.bf16.mxu0 %v1406_v32  ;;  %629 = vmatprep.subr.bf16.mxu1 %v1408_v34  ;;  %v1633_v32 = vld [vmem:[#allocation8 + $0xf8] sm:$0xff]  }
  0x79   :  { %v1635_v34 = vld [vmem:[#allocation8 + $0xb8] sm:$0xff]  }
  0x7b   :  { %589 = vmatpush1.bf16.msra.mxu0 %v1405_v37  ;;  %630 = vmatpush1.bf16.msra.mxu1 %v1407_v40  ;;  %v140_v37 = vlaneseq  ;;  %v1887_v40 = vld [vmem:[#allocation7] sm:$0xff] }
  0x7c   :  { %590 = vmatprep.subr.bf16.mxu0 %v1414_v0  ;;  %631 = vmatprep.subr.bf16.mxu1 %v1416_v43 }
  0x7d   :  { %v1884_v38 = vshrl.u32 %v140_v37, 7  ;;  %v1663_v37 = vld [vmem:[#allocation8 + $0x1b0] sm:$0xff]  }
  0x7f   :  { %591 = vmatpush1.bf16.msra.mxu0 %v1413_v44  ;;  %632 = vmatpush1.bf16.msra.mxu1 %v1415_v47  ;;  %v142_v39 = vsub.s32 0, %v1884_v38  ;;  %v150_v0 = vsub.s32 2, %v1884_v38  ;;  %v146_v41 = vsub.s32 1, %v1884_v38  ;;  %v154_v42 = vsub.s32 3, %v1884_v38 }
  0x80   :  { %592 = vmatprep.subr.bf16.mxu0 %v1422_v48  ;;  %633 = vmatprep.subr.bf16.mxu1 %v1424_v51 }
  0x81   :  { %v143_v43 = vrot.slane %v1887_v40, %v142_v39  ;;  %v151_v44 = vrot.slane %v1887_v40, %v150_v0  ;;  %v147_v45 = vrot.slane %v1887_v40, %v146_v41  ;;  %v155_v46 = vrot.slane %v1887_v40, %v154_v42  ;;  %v1664_v39 = vld [vmem:[#allocation8 + $0x178] sm:$0xff]  }
  0x83   :  { %593 = vmatpush1.bf16.msra.mxu0 %v1421_v52  ;;  %634 = vmatpush1.bf16.msra.mxu1 %v1423_v55 }
  0x84   :  { %594 = vmatprep.subr.bf16.mxu0 %v1430_v56  ;;  %635 = vmatprep.subr.bf16.mxu1 %v1432_v59 }
  0x87   :  { %595 = vmatpush1.bf16.msra.mxu0 %v1429_v60  ;;  %636 = vmatpush1.bf16.msra.mxu1 %v1431_v61 }
  0x88   :  { %596 = vmatprep.subr.bf16.mxu0 %v1438_v62  ;;  %637 = vmatprep.subr.bf16.mxu1 %v1440_v63 }
  0x8b   :  { %597 = vmatpush1.bf16.msra.mxu0 %v1437_v2  ;;  %638 = vmatpush1.bf16.msra.mxu1 %v1439_v4 }
  0x8c   :  { %1506 = vmatprep.subr.bf16.mxu0 %v1604_v1  ;;  %1528 = vmatprep.subr.bf16.mxu1 %v1605_v3  ;;  %v1638_v3 = vld [vmem:[#allocation8 + $0x100] sm:$0xff]  }
  0x8e   :  { %615 = vmatmul.mubr.bf16.vlgmr.msra.gmra.mrb[4].mxu0 %v1876_v9  ;;  %656 = vmatmul.mubr.bf16.vlgmr.msra.gmra.mrb[4].mxu1 %v1876_v9  ;;  %v1621_v9 = vld [vmem:[#allocation8 + $0xe0] sm:$0xff]  }
  0x8f   :  { %1507 = vmatpush3.bf16.msra.mxu0 %v1606_v5  ;;  %1529 = vmatpush3.bf16.msra.mxu1 %v1607_v6  ;;  %v1639_v5 = vld [vmem:[#allocation8 + $0x180] sm:$0xff]   ;;  %v1640_v6 = vld [vmem:[#allocation8 + $0x148] sm:$0xff]  }
  0x90   :  { %1508 = vmatprep.subr.bf16.mxu0 %v1608_v7  ;;  %1530 = vmatprep.subr.bf16.mxu1 %v1609_v8  ;;  %v1641_v7 = vld [vmem:[#allocation8 + $0x1c8] sm:$0xff]  }
  0x91   :  { %v1642_v8 = vld [vmem:[#allocation8 + $0x108] sm:$0xff]  }
  0x93   :  { %1509 = vmatpush3.bf16.msra.mxu0 %v1610_v10  ;;  %1531 = vmatpush3.bf16.msra.mxu1 %v1611_v11  ;;  %v1643_v10 = vld [vmem:[#allocation8 + $0x188] sm:$0xff]   ;;  %v1644_v11 = vld [vmem:[#allocation8 + $0x150] sm:$0xff]  }
  0x94   :  { %1510 = vmatprep.subr.bf16.mxu0 %v1612_v12  ;;  %1532 = vmatprep.subr.bf16.mxu1 %v1613_v13  ;;  %v1645_v12 = vld [vmem:[#allocation8 + $0x1d0] sm:$0xff]  }
  0x95   :  { %v1646_v13 = vld [vmem:[#allocation8 + $0x110] sm:$0xff]  }
  0x97   :  { %1511 = vmatpush3.bf16.msra.mxu0 %v1614_v14  ;;  %1533 = vmatpush3.bf16.msra.mxu1 %v1615_v15  ;;  %v1647_v14 = vld [vmem:[#allocation8 + $0x190] sm:$0xff]   ;;  %v1648_v15 = vld [vmem:[#allocation8 + $0x158] sm:$0xff]  }
  0x98   :  { %1512 = vmatprep.subr.bf16.mxu0 %v1616_v16  ;;  %1534 = vmatprep.subr.bf16.mxu1 %v1617_v17  ;;  %v1649_v16 = vld [vmem:[#allocation8 + $0x1d8] sm:$0xff]  }
  0x99   :  { %v1650_v17 = vld [vmem:[#allocation8 + $0x118] sm:$0xff]  }
  0x9b   :  { %1513 = vmatpush3.bf16.msra.mxu0 %v1618_v18  ;;  %1535 = vmatpush3.bf16.msra.mxu1 %v1619_v19  ;;  %v1651_v18 = vld [vmem:[#allocation8 + $0x198] sm:$0xff]   ;;  %v1652_v19 = vld [vmem:[#allocation8 + $0x160] sm:$0xff]  }
  0x9c   :  { %1514 = vmatprep.subr.bf16.mxu0 %v1620_v20  ;;  %1536 = vmatprep.subr.bf16.mxu1 %v1621_v9  ;;  %v1653_v20 = vld [vmem:[#allocation8 + $0x1e0] sm:$0xff]  }
  0x9d   :  { %v1654_v9 = vld [vmem:[#allocation8 + $0x120] sm:$0xff]  }
  0x9f   :  { %1515 = vmatpush3.bf16.msra.mxu0 %v1622_v21  ;;  %1537 = vmatpush3.bf16.msra.mxu1 %v1623_v22  ;;  %v1655_v21 = vld [vmem:[#allocation8 + $0x1a0] sm:$0xff]   ;;  %v1656_v22 = vld [vmem:[#allocation8 + $0x168] sm:$0xff]  }
  0xa0   :  { %1516 = vmatprep.subr.bf16.mxu0 %v1624_v23  ;;  %1538 = vmatprep.subr.bf16.mxu1 %v1625_v24  ;;  %v1657_v23 = vld [vmem:[#allocation8 + $0x1e8] sm:$0xff]   ;;  %v158_v24 = vsub.s32 4, %v1884_v38 }
  0xa3   :  { %1517 = vmatpush3.bf16.msra.mxu0 %v1626_v25  ;;  %1539 = vmatpush3.bf16.msra.mxu1 %v1627_v26  ;;  %v1658_v25 = vld [vmem:[#allocation8 + $0x128] sm:$0xff]   ;;  %v166_v26 = vsub.s32 6, %v1884_v38 }
  0xa4   :  { %1518 = vmatprep.subr.bf16.mxu0 %v1628_v27  ;;  %1540 = vmatprep.subr.bf16.mxu1 %v1629_v28  ;;  %v162_v27 = vsub.s32 5, %v1884_v38  ;;  %v1659_v28 = vld [vmem:[#allocation8 + $0x1a8] sm:$0xff]  }
  0xa7   :  { %1519 = vmatpush3.bf16.msra.mxu0 %v1630_v29  ;;  %1541 = vmatpush3.bf16.msra.mxu1 %v1631_v30  ;;  %v170_v29 = vsub.s32 7, %v1884_v38  ;;  %v1660_v30 = vld [vmem:[#allocation8 + $0x170] sm:$0xff]   ;;  %v1665_v38 = vld [vmem:[#allocation8 + $0x1f8] sm:$0xff]  }
  0xa8   :  { %1520 = vmatprep.subr.bf16.mxu0 %v1632_v31  ;;  %1542 = vmatprep.subr.bf16.mxu1 %v1633_v32  ;;  %v1661_v31 = vld [vmem:[#allocation8 + $0x1f0] sm:$0xff]   ;;  %v159_v32 = vrot.slane %v1887_v40, %v158_v24 }
  0xab   :  { %1521 = vmatpush3.bf16.msra.mxu0 %v1634_v33  ;;  %1543 = vmatpush3.bf16.msra.mxu1 %v1635_v34  ;;  %v167_v33 = vrot.slane %v1887_v40, %v166_v26  ;;  %v163_v34 = vrot.slane %v1887_v40, %v162_v27 }
  0xac   :  { %1550 = vmatprep.subr.bf16.mxu0 %v1636_v35  ;;  %1572 = vmatprep.subr.bf16.mxu1 %v1637_v36  ;;  %v1662_v35 = vld [vmem:[#allocation8 + $0x130] sm:$0xff]   ;;  %v171_v36 = vrot.slane %v1887_v40, %v170_v29 }
 0x141   :  { %v534_v47 = vpop.f32.mrb[0].mxu0  ;;  %v575_v49 = vpop.f32.mrb[0].mxu1 }
 0x142   :  { %v535_v48 = vadd.f32 %v534_v47, %v143_v43  ;;  %v536_v50 = vpop.f32.mrb[1].mxu0  ;;  %v576_v51 = vadd.f32 %v575_v49, %v151_v44  ;;  %v577_v53 = vpop.f32.mrb[1].mxu1 }
 0x143   :  { %v537_v52 = vadd.f32 %v536_v50, %v147_v45  ;;  %v538_v54 = vpop.f32.mrb[2].mxu0  ;;  %v578_v56 = vadd.f32 %v577_v53, %v155_v46  ;;  %v579_v57 = vpop.f32.mrb[2].mxu1 }
 0x144   :  { %v664_v55 = vmax.f32 %v535_v48, 0.0  ;;  %v539_v58 = vpop.f32.mrb[3].mxu0  ;;  %v666_v59 = vmax.f32 %v576_v51, 0.0  ;;  %v580_v61 = vpop.f32.mrb[3].mxu1  ;;  %v1666_v48 = vld [vmem:[#allocation8 + $0x138] sm:$0xff]  }
 0x145   :  { %v665_v60 = vmax.f32 %v537_v52, 0.0  ;;  %v667_v63 = vmax.f32 %v578_v56, 0.0  ;;  %v1667_v52 = vld [vmem:[#allocation8 + $0x1b8] sm:$0xff]  }
 0x146   :  { %v672_v62 = vpack.c.bf16 %v664_v55, %v664_v55  ;;  %v674_v1 = vpack.c.bf16 %v666_v59, %v666_v59 }
 0x147   :  { %v673_v2 = vpack.c.bf16 %v665_v60, %v665_v60  ;;  %v675_v4 = vpack.c.bf16 %v667_v63, %v667_v63  ;;  %v1441_v63 = vld [vmem:[%s1923_s4] ss:$0 sm:$0xff]  ;;  %s1795_s4 = smov [#allocation10]  }
 0x148   :  { %s1366_s1 = sshll.u32 %s1795_s4, 4  ;;  %s1367_s1 = int_to_ptr.vmem [resolvable:$true] %s1366_s1 }
 0x149   :  { %1231 = vmatprep.mubr.bf16.mxu0 %v673_v2  ;;  %1271 = vmatprep.mubr.bf16.mxu1 %v675_v4  ;;  %s1756_s18 = scalar_lea.vmem %s1367_s1, 128  ;;  %p1761_p5 = scmp.lt.s32.totalorder %s1367_s1, %s1367_s1 }
 0x14a   :  { %1232 = vmatmul.mubr.bf16.vlgmr.msra.gmra.mrb[8].mxu0 %v672_v62  ;;  %1272 = vmatmul.mubr.bf16.vlgmr.msra.gmra.mrb[8].mxu1 %v674_v1  ;;  %p1757_p4 = scmp.ne.s32.totalorder %s1367_s1, %s1756_s18  ;;  %p1762_p6 = scmp.lt.s32.totalorder %s1756_s18, %s1756_s18 }
 0x14b   :  { %1551 = vmatpush3.bf16.msra.mxu0 %v1638_v3  ;;  %1573 = vmatpush3.bf16.msra.mxu1 %v1639_v5 }
 0x14c   :  { %1552 = vmatprep.subr.bf16.mxu0 %v1640_v6  ;;  %1574 = vmatprep.subr.bf16.mxu1 %v1641_v7  ;;  %p1763_p7 = por %p1762_p6, %p1761_p5 }
 0x14e   :  { %p1764_p8 = pnand %p1763_p7, %p1757_p4 }
 0x14f   :  { %1553 = vmatpush3.bf16.msra.mxu0 %v1642_v8  ;;  %1575 = vmatpush3.bf16.msra.mxu1 %v1643_v10 }
 0x150   :  { %1554 = vmatprep.subr.bf16.mxu0 %v1644_v11  ;;  %1576 = vmatprep.subr.bf16.mxu1 %v1645_v12 }
 0x153   :  { %1555 = vmatpush3.bf16.msra.mxu0 %v1646_v13  ;;  %1577 = vmatpush3.bf16.msra.mxu1 %v1647_v14 }
 0x154   :  { %1556 = vmatprep.subr.bf16.mxu0 %v1648_v15  ;;  %1578 = vmatprep.subr.bf16.mxu1 %v1649_v16 }
 0x157   :  { %1557 = vmatpush3.bf16.msra.mxu0 %v1650_v17  ;;  %1579 = vmatpush3.bf16.msra.mxu1 %v1651_v18 }
 0x158   :  { %1558 = vmatprep.subr.bf16.mxu0 %v1652_v19  ;;  %1580 = vmatprep.subr.bf16.mxu1 %v1653_v20 }
 0x15b   :  { %1559 = vmatpush3.bf16.msra.mxu0 %v1654_v9  ;;  %1581 = vmatpush3.bf16.msra.mxu1 %v1655_v21 }
 0x15c   :  { %1560 = vmatprep.subr.bf16.mxu0 %v1656_v22  ;;  %1582 = vmatprep.subr.bf16.mxu1 %v1657_v23 }
 0x15f   :  { %1561 = vmatpush3.bf16.msra.mxu0 %v1658_v25  ;;  %1583 = vmatpush3.bf16.msra.mxu1 %v1659_v28 }
 0x160   :  { %1562 = vmatprep.subr.bf16.mxu0 %v1660_v30  ;;  %1584 = vmatprep.subr.bf16.mxu1 %v1661_v31 }
 0x161   :  { %v616_v0 = vpop.f32.mrb[4].mxu0  ;;  %v657_v42 = vpop.f32.mrb[4].mxu1 }
 0x162   :  { %v617_v41 = vadd.f32 %v616_v0, %v159_v32  ;;  %v618_v43 = vpop.f32.mrb[5].mxu0  ;;  %v658_v44 = vadd.f32 %v657_v42, %v167_v33  ;;  %v659_v46 = vpop.f32.mrb[5].mxu1 }
 0x163   :  { %v619_v45 = vadd.f32 %v618_v43, %v163_v34  ;;  %v620_v47 = vpop.f32.mrb[6].mxu0  ;;  %1563 = vmatpush3.bf16.msra.mxu0 %v1662_v35  ;;  %v660_v50 = vadd.f32 %v659_v46, %v171_v36  ;;  %v661_v51 = vpop.f32.mrb[6].mxu1  ;;  %1585 = vmatpush3.bf16.msra.mxu1 %v1663_v37 }
 0x164   :  { %v668_v49 = vmax.f32 %v617_v41, 0.0  ;;  %v621_v40 = vpop.f32.mrb[7].mxu0  ;;  %1564 = vmatprep.subr.bf16.mxu0 %v1664_v39  ;;  %v670_v53 = vmax.f32 %v658_v44, 0.0  ;;  %v662_v55 = vpop.f32.mrb[7].mxu1  ;;  %1586 = vmatprep.subr.bf16.mxu1 %v1665_v38 }
 0x165   :  { %v669_v54 = vmax.f32 %v619_v45, 0.0  ;;  %v671_v56 = vmax.f32 %v660_v50, 0.0 }
 0x166   :  { %v678_v57 = vpack.c.bf16 %v670_v53, %v670_v53  ;;  %v676_v59 = vpack.c.bf16 %v668_v49, %v668_v49 }
 0x167   :  { %v677_v58 = vpack.c.bf16 %v669_v54, %v669_v54  ;;  %1565 = vmatpush3.bf16.msra.mxu0 %v1666_v48  ;;  %v679_v60 = vpack.c.bf16 %v671_v56, %v671_v56  ;;  %1587 = vmatpush3.bf16.msra.mxu1 %v1667_v52 }
 0x169   :  { %1311 = vmatprep.mubr.bf16.mxu0 %v677_v58  ;;  %1351 = vmatprep.mubr.bf16.mxu1 %v679_v60 }
 0x16a   :  { %1312 = vmatmul.mubr.bf16.vlgmr.msra.gmra.mrb[12].mxu0 %v676_v59  ;;  %1352 = vmatmul.mubr.bf16.vlgmr.msra.gmra.mrb[12].mxu1 %v678_v57 }
 0x21d   :  { %v1522_v61 = vpop.f32.mrb[8].mxu0  ;;  %v1544_v62 = vpop.f32.mrb[8].mxu1 }
 0x21e   :  { %v1523_v1 = vpop.f32.mrb[9].mxu0  ;;  %v1545_v3 = vpop.f32.mrb[9].mxu1 }
 0x21f   :  { %v1524_v2 = vadd.f32 %v1523_v1, %v1522_v61  ;;  %v1525_v4 = vpop.f32.mrb[10].mxu0  ;;  %v1546_v5 = vadd.f32 %v1545_v3, %v1544_v62  ;;  %v1547_v6 = vpop.f32.mrb[10].mxu1 }
 0x220   :  { %v1526_v7 = vpop.f32.mrb[11].mxu0  ;;  %v1548_v10 = vpop.f32.mrb[11].mxu1 }
 0x221   :  { %v1234_v8 = vadd.f32 %v1524_v2, %v1441_v63 }
 0x223   :  { %v1274_v11 = vadd.f32 %v1546_v5, %v1234_v8 }
 0x23d   :  { %v1566_v12 = vpop.f32.mrb[12].mxu0  ;;  %v1588_v13 = vpop.f32.mrb[12].mxu1 }
 0x23e   :  { %v1567_v14 = vpop.f32.mrb[13].mxu0  ;;  %v1589_v16 = vpop.f32.mrb[13].mxu1 }
 0x23f   :  { %v1568_v15 = vadd.f32 %v1567_v14, %v1566_v12  ;;  %v1569_v17 = vpop.f32.mrb[14].mxu0  ;;  %v1590_v18 = vadd.f32 %v1589_v16, %v1588_v13  ;;  %v1591_v19 = vpop.f32.mrb[14].mxu1 }
 0x240   :  { %v1570_v20 = vpop.f32.mrb[15].mxu0  ;;  %v1592_v21 = vpop.f32.mrb[15].mxu1 }
 0x241   :  { %v1314_v9 = vadd.f32 %v1568_v15, %v1274_v11 }
 0x243   :  { %v1354_v22 = vadd.f32 %v1590_v18, %v1314_v9 }
 0x245   :  { %1359 = vst [vmem:[#allocation10] sm:$0xff] %v1354_v22 }
 0x246   :  { %1767 = shalt.err (!%p1764_p8)
}
 0x247   :  { %s1768_s21 = scalar_lea.hbm %s1924_s5, 128 }
 0x248   :  { %p1769_p9 = scmp.ne.s32.totalorder %s1924_s5, %s1768_s21  ;;  %p1772_p10 = scmp.lt.u32.totalorder %s1768_s21, %s1924_s5 }
 0x24a   :  { %p1774_p11 = pnand %p1772_p10, %p1769_p9 }
 0x24c   :  { %1777 = shalt.err (!%p1774_p11)
}
 0x24d   :  { %1369 = dma.vmem_to_hbm [thread:$0]  %s1367_s1, 128, %s1924_s5, [#allocation4]  }
 0x24e   :  { %1784 = dma.done.wait [#allocation4], 128  }
 0x24f   :  { %1785 = vsyncadd [#allocation4], 4294967168 }
 0x250   :  { %1373 = vsyncpa [#allocation3], 1 }
 0x251   :  { %1374 = vsyncpa [#allocation6], 1 }
 0x252   :  { %1375 = vsyncpa [#allocation9], 1 }
 0x253   :  { %1376 = vsyncpa [#allocation4], 1 }

</bundles_post_ra>
